<compile_context>
chip_gen: v7x
topology: tpu7x:2x2x1
jax: 0.10.0
libtpu: 0.0.40
codegen_flags: <defaults>
</compile_context>

<pallas_src>
import jax
import jax.numpy as jnp
from jax import lax
from jax.experimental import pallas as pl
from jax.experimental.pallas import tpu as pltpu


def _round_up(a, m):
    return -(-a // m) * m


def _time2vec_kernel(xT_ref, we_ref, mask_ref, o_ref):
    # xT_ref:   (K_pad, TB) f32 — packed x columns (lane-dense); row `pack`
    #           is all-ones (bias), remaining rows are zero padding.
    # we_ref:   (K_pad, L)  f32 — sparse expansion weights + bias row.
    # mask_ref: (1, L)      f32 — 1.0 on periodic (sin) columns, 0.0 on linear.
    # o_ref:    (TB, L)     f32 — lane-dense output tile (unmasked stores).
    #
    # MXU affine expansion: z[r, p*D + j] = x[r, p] * w_all[j] + b_all[j].
    z = lax.dot_general(
        xT_ref[...], we_ref[...],
        dimension_numbers=(((0,), (0,)), ((), ())),     # contract over K_pad
        preferred_element_type=jnp.float32,
        precision=lax.Precision.HIGHEST,                # keep ~f32 accuracy
    )                                                   # (TB, L)
    periodic = mask_ref[...] != 0.0                     # (1, L), broadcast below
    # sin() (EUP) on periodic columns, identity on the linear column; the
    # select is the only per-element VALU work left.
    o_ref[...] = jnp.where(periodic, jnp.sin(z), z).astype(o_ref.dtype)


def time2vec(x, w0, b0, w, b, *, row_tile=8192):
    """x: (B, 1). w0,b0: (1,1). w,b: (1, D-1). Returns (B, D) float32."""
    x = x.astype(jnp.float32)
    B = int(x.shape[0])
    D = int(w.shape[1]) + 1

    # Column order matches torch.cat([v1, v2], 1): [w..., w0].
    w_all = jnp.concatenate([w, w0], axis=1).astype(jnp.float32)[0]   # (D,)
    b_all = jnp.concatenate([b, b0], axis=1).astype(jnp.float32)[0]   # (D,)

    # Lane packing: PACK logical rows side by side in one 128-lane output row.
    if D <= 128 and 128 % D == 0:
        pack = 128 // D
        L = pack * D                 # == 128
    else:
        pack = 1
        L = _round_up(D, 128)        # pad lanes -> full-width unmasked stores
    K = pack + 1                     # + all-ones bias row
    K_pad = _round_up(K, 8)          # sublane-align the contraction dim

    # --- Batch tiling over packed rows. ---
    R = -(-B // pack)                # packed logical rows
    if R <= min(int(row_tile), 512):
        # Tiny problem: one sublane-aligned tile.
        tb = _round_up(max(R, 1), 8)
        r_pad = tb
    else:
        # >= 2 grid steps so both v7x TensorCores get work; tb is a multiple
        # of 128 so the lane-dense xT block and output rows stay aligned.
        steps = max(2, -(-R // int(row_tile)))
        tb = _round_up(-(-R // steps), 128)
        r_pad = _round_up(R, tb)
    grid = (r_pad // tb,)

    # --- Inputs in lane-dense layouts. ---
    # xT[p, r] = x[r*pack + p]; row `pack` is 1.0 (bias); rows > pack are 0.
    x_flat = jnp.pad(x.reshape(-1), (0, r_pad * pack - B))
    xT = jnp.zeros((K_pad, r_pad), jnp.float32)
    xT = xT.at[:pack, :].set(x_flat.reshape(r_pad, pack).T)
    xT = xT.at[pack, :].set(1.0)

    # Expansion weights: wE[p, p*D + j] = w_all[j]; bias row wE[pack, p*D + j] = b_all[j].
    eye = jnp.eye(pack, dtype=jnp.float32)
    w_rows = (eye[:, :, None] * w_all[None, None, :]).reshape(pack, pack * D)
    b_row = jnp.tile(b_all, pack)
    wE = jnp.zeros((K_pad, L), jnp.float32)
    wE = wE.at[:pack, :pack * D].set(w_rows)
    wE = wE.at[pack, :pack * D].set(b_row)

    # Periodic/linear column mask, precomputed once and reused every tile.
    col = jnp.arange(L)
    is_linear = (col < pack * D) & ((col % D) == (D - 1))
    mask = jnp.where(is_linear, 0.0, 1.0).astype(jnp.float32).reshape(1, L)

    cost = pl.CostEstimate(
        flops=2 * r_pad * L * K_pad,
        transcendentals=r_pad * L,
        bytes_accessed=4 * (K_pad * r_pad + K_pad * L + L + r_pad * L),
    )

    out_packed = pl.pallas_call(
        _time2vec_kernel,
        out_shape=jax.ShapeDtypeStruct((r_pad, L), jnp.float32),
        grid_spec=pltpu.PrefetchScalarGridSpec(
            num_scalar_prefetch=0,
            grid=grid,
            in_specs=[
                pl.BlockSpec((K_pad, tb), lambda i: (0, i)),   # xT (lane-dense)
                pl.BlockSpec((K_pad, L), lambda i: (0, 0)),    # wE (tiny, reused)
                pl.BlockSpec((1, L), lambda i: (0, 0)),        # mask (tiny, reused)
            ],
            out_specs=pl.BlockSpec((tb, L), lambda i: (i, 0)),
        ),
        compiler_params=pltpu.CompilerParams(
            dimension_semantics=("parallel",)),
        cost_estimate=cost,
    )(xT, wE, mask)

    # TODO(synk): on v5e (HBM-write-bound) a bf16 out_shape halves store bytes
    # if downstream tolerates it; kept f32 here to preserve 1e-5 accuracy.
    if pack > 1:
        # Free row-major unpack: (r_pad, pack*D) -> (r_pad*pack, D), drop padding.
        return out_packed.reshape(r_pad * pack, D)[:B]
    return out_packed[:B, :D]


def time2vec_ref(x, w0, b0, w, b):
    # (B,1) @ (1,K) is an outer product; broadcasting is the same math as the
    # torch.matmul in the spec (kept in f32 for a clean comparison).
    v1 = jnp.sin(x * w + b)
    v2 = x * w0 + b0
    return jnp.concatenate([v1, v2], axis=1)


if __name__ == "__main__":
    out_dim = 32
    batch = 8

    key = jax.random.PRNGKey(0)
    k_x, k_w0, k_b0, k_w, k_b = jax.random.split(key, 5)

    # Deterministic "randn"-style parameter init (shapes from __init__).
    w0 = jax.random.normal(k_w0, (1, 1), dtype=jnp.float32)
    b0 = jax.random.normal(k_b0, (1, 1), dtype=jnp.float32)
    w = jax.random.normal(k_w, (1, out_dim - 1), dtype=jnp.float32)
    b = jax.random.normal(k_b, (1, out_dim - 1), dtype=jnp.float32)

    # Example input: (batch, 1) time values.
    x = jax.random.normal(k_x, (batch, 1), dtype=jnp.float32)

    out = jax.block_until_ready(time2vec(x, w0, b0, w, b))
    ref = time2vec_ref(x, w0, b0, w, b)
    assert out.shape == (batch, out_dim), out.shape
    assert jnp.allclose(out, ref, atol=1e-5, rtol=1e-5), \
        float(jnp.max(jnp.abs(out - ref)))

    # Also exercise batch padding (batch % pack != 0) and the multi-tile
    # pipelined path (grid >= 2) with a small row tile.
    batch2 = 1000
    x2 = jax.random.normal(jax.random.PRNGKey(1), (batch2, 1), dtype=jnp.float32)
    out2 = jax.block_until_ready(time2vec(x2, w0, b0, w, b, row_tile=64))
    ref2 = time2vec_ref(x2, w0, b0, w, b)
    assert out2.shape == (batch2, out_dim), out2.shape
    assert jnp.allclose(out2, ref2, atol=1e-5, rtol=1e-5), \
        float(jnp.max(jnp.abs(out2 - ref2)))

    print("KERNEL_OK")
</pallas_src>

<mosaic_0001>
module attributes {stable_mosaic.version = 11 : i64} {
  func.func @_time2vec_kernel(%arg0: i32, %arg1: memref<8x8xf32, #tpu.memory_space<vmem>>, %arg2: memref<8x128xf32, #tpu.memory_space<vmem>>, %arg3: memref<1x128xf32, #tpu.memory_space<vmem>>, %arg4: memref<8x128xf32, #tpu.memory_space<vmem>>) attributes {dimension_semantics = [#tpu.dimension_semantics<parallel>], iteration_bounds = array<i64: 1>, scalar_prefetch = 0 : i64, scratch_operands = 0 : i64, tpu.core_type = #tpu.core_type<tc>, window_params = [{transform_indices = @transform_0, window_bounds = array<i64: 8, 8>}, {pipeline_mode = #tpu.pipeline_mode<synchronous>, transform_indices = @transform_1, window_bounds = array<i64: 8, 128>}, {pipeline_mode = #tpu.pipeline_mode<synchronous>, transform_indices = @transform_2, window_bounds = array<i64: 1, 128>}, {transform_indices = @transform_3, window_bounds = array<i64: 8, 128>}]} {
    %c0 = arith.constant 0 : index
    %c0_0 = arith.constant 0 : index
    %0 = vector.load %arg1[%c0, %c0_0] : memref<8x8xf32, #tpu.memory_space<vmem>>, vector<8x8xf32>
    %c0_1 = arith.constant 0 : index
    %c0_2 = arith.constant 0 : index
    %1 = vector.load %arg2[%c0_1, %c0_2] : memref<8x128xf32, #tpu.memory_space<vmem>>, vector<8x128xf32>
    %cst = arith.constant dense<0.000000e+00> : vector<8x128xf32>
    %2 = tpu.matmul %0, %1, %cst {dimension_numbers = #tpu.dot_dimension_numbers<[0], [0], [1], [1], [0, 1, 1, 1], [], []>, precision = #tpu.contract_precision<fp32>} : vector<8x8xf32>, vector<8x128xf32>, vector<8x128xf32> -> vector<8x128xf32>
    %c0_3 = arith.constant 0 : index
    %c0_4 = arith.constant 0 : index
    %3 = vector.load %arg3[%c0_3, %c0_4] : memref<1x128xf32, #tpu.memory_space<vmem>>, vector<1x128xf32>
    %cst_5 = arith.constant 0.000000e+00 : f32
    %4 = vector.broadcast %cst_5 : f32 to vector<1x128xf32>
    %5 = arith.cmpf one, %3, %4 : vector<1x128xf32>
    %6 = math.sin %2 : vector<8x128xf32>
    %7 = vector.shape_cast %5 : vector<1x128xi1> to vector<1x128xi1>
    %8 = vector.broadcast %7 : vector<1x128xi1> to vector<8x128xi1>
    %9 = arith.select %8, %6, %2 : vector<8x128xi1>, vector<8x128xf32>
    %c0_6 = arith.constant 0 : index
    %c0_7 = arith.constant 0 : index
    %10 = vector.load %arg4[%c0_6, %c0_7] : memref<8x128xf32, #tpu.memory_space<vmem>>, vector<8x128xf32>
    tpu.vector_store %arg4[%c0_6, %c0_7], %9 {strides = array<i32>} : memref<8x128xf32, #tpu.memory_space<vmem>>, vector<8x128xf32>,
    return
  }
  func.func @transform_0(%arg0: i32) -> (i32, i32) {
    %c0_i32 = arith.constant 0 : i32
    %c0_i32_0 = arith.constant 0 : i32
    return %c0_i32, %arg0 : i32, i32
  }
  func.func @transform_1(%arg0: i32) -> (i32, i32) {
    %c0_i32 = arith.constant 0 : i32
    %c0_i32_0 = arith.constant 0 : i32
    %c0_i32_1 = arith.constant 0 : i32
    return %c0_i32, %c0_i32_0 : i32, i32
  }
  func.func @transform_2(%arg0: i32) -> (i32, i32) {
    %c0_i32 = arith.constant 0 : i32
    %c0_i32_0 = arith.constant 0 : i32
    %c0_i32_1 = arith.constant 0 : i32
    return %c0_i32, %c0_i32_0 : i32, i32
  }
  func.func @transform_3(%arg0: i32) -> (i32, i32) {
    %c0_i32 = arith.constant 0 : i32
    %c0_i32_0 = arith.constant 0 : i32
    return %arg0, %c0_i32 : i32, i32
  }
}

</mosaic_0001>

<bundles_post_ra>
// kernel: tpu_custom_call.1
= control target key start
LH: loop header
LB: loop body
LE: loop exit
PB: predicated region body
PF: predicated region fallthrough
CT: control target
= control target key end

     0   :  { %8 = vsyncpa [#allocation3], 0  ;;  %s899_s0 = inlined_call_operand.hbm [shape: f32[8,8], index: 0, kind: input, shape index: {}]   ;;  %s900_s1 = inlined_call_operand.hbm [shape: f32[8,128], index: 1, kind: input, shape index: {}]   ;;  %s901_s2 = inlined_call_operand.vmem [shape: f32[1,128], index: 2, kind: input, shape index: {}]   ;;  %s902_s3 = inlined_call_operand.hbm [shape: f32[8,128], index: 3, kind: output, shape index: {}]  }
   0x1   :  { %9 = vsyncpa [#allocation6], 0 }
   0x2   :  { %10 = vsyncpa [#allocation4], 0  ;;  %s800_s12 = smov [#allocation2]   ;;  %s801_s14 = smov [#allocation5]  }
   0x3   :  { %s17_s13 = sshll.u32 %s800_s12, 4  ;;  %s27_s15 = sshll.u32 %s801_s14, 4  ;;  %s18_s13 = int_to_ptr.vmem [resolvable:$true] %s17_s13  ;;  %s28_s15 = int_to_ptr.vmem [resolvable:$true] %s27_s15 }
   0x4   :  { %s728_s18 = scalar_lea.hbm %s899_s0, 128 }
   0x5   :  { %p729_p0 = scmp.ne.s32.totalorder %s899_s0, %s728_s18  ;;  %p732_p1 = scmp.lt.u32.totalorder %s728_s18, %s899_s0 }
   0x7   :  { %p734_p2 = pnand %p732_p1, %p729_p0 }
   0x9   :  { %737 = shalt.err (!%p734_p2)
}
   0xa   :  { %s738_s23 = scalar_lea.vmem %s18_s13, 128  ;;  %p743_p4 = scmp.lt.s32.totalorder %s18_s13, %s18_s13 }
   0xb   :  { %p739_p3 = scmp.ne.s32.totalorder %s18_s13, %s738_s23  ;;  %p744_p5 = scmp.lt.s32.totalorder %s738_s23, %s738_s23 }
   0xd   :  { %p745_p6 = por %p744_p5, %p743_p4 }
   0xf   :  { %p746_p7 = pnand %p745_p6, %p739_p3 }
  0x11   :  { %749 = shalt.err (!%p746_p7)
}
  0x12   :  { %20 = dma.hbm_to_vmem [thread:$0]  %s899_s0, 128, %s18_s13, [#allocation3]  }
  0x13   :  { %s750_s28 = scalar_lea.hbm %s900_s1, 128 }
  0x14   :  { %p751_p8 = scmp.ne.s32.totalorder %s900_s1, %s750_s28  ;;  %p754_p9 = scmp.lt.u32.totalorder %s750_s28, %s900_s1 }
  0x16   :  { %p756_p10 = pnand %p754_p9, %p751_p8 }
  0x18   :  { %759 = shalt.err (!%p756_p10)
}
  0x19   :  { %s760_s6 = scalar_lea.vmem %s28_s15, 128  ;;  %p765_p12 = scmp.lt.s32.totalorder %s28_s15, %s28_s15 }
  0x1a   :  { %p761_p11 = scmp.ne.s32.totalorder %s28_s15, %s760_s6  ;;  %p766_p13 = scmp.lt.s32.totalorder %s760_s6, %s760_s6 }
  0x1c   :  { %p767_p0 = por %p766_p13, %p765_p12 }
  0x1e   :  { %p768_p1 = pnand %p767_p0, %p761_p11 }
  0x20   :  { %771 = shalt.err (!%p768_p1)
}
  0x21   :  { %30 = dma.hbm_to_vmem [thread:$0]  %s900_s1, 128, %s28_s15, [#allocation6]  }
  0x22   :  { %794 = dma.done.wait [#allocation3], 128  }
  0x23   :  { %795 = vsyncadd [#allocation3], 4294967168 }
  0x24   :  { %796 = dma.done.wait [#allocation6], 128  }
  0x25   :  { %797 = vsyncadd [#allocation6], 4294967168  ;;  %v39_v0 = vld [vmem:[#allocation2] sm:$0xff]  ;;  %v40_v1 = vld [vmem:[#allocation5] sm:$0xff]  ;;  %v802_v2 = vmov 0.0   ;;  %vm803_vm0 = vmmov 0  }
  0x26   :  { %41 = vxpose.xlu0.b32.start.end [1/1] (short) (narrow) %v39_v0, 8  ;;  %684 = vmatprep.subr.mxu0 %v802_v2  ;;  %v78_v3 = vand.u32 4294901760, %v40_v1  ;;  %vm73_vm1 = vcmask 64512   ;;  %v804_v31 = vmov 2102212464   ;;  %s811_s9 = smov [#allocation7]  }
  0x27   :  { %686 = vmatprep.mubr.msk.f32.mxu0 %vm803_vm0, %v802_v2  ;;  %669 = vmatprep.subr.mxu1 %v802_v2  ;;  %v805_v33 = vmov 920167782   ;;  %v806_v37 = vmov 1326507024   ;;  %v807_v39 = vmov 683565275  }
  0x28   :  { %671 = vmatprep.mubr.msk.f32.mxu1 %vm803_vm0, %v802_v2  ;;  %685 = vmatpush3.msra.mxu0 %v78_v3  ;;  %v155_v4 = vsub.f32 %v40_v1, %v78_v3  ;;  %v808_v41 = vmov 2475754826   ;;  %v809_v44 = vmov 2131351028   ;;  %s643_s10 = sshll.u32 %s811_s9, 4  ;;  %s644_s10 = int_to_ptr.vmem [resolvable:$true] %s643_s10 }
  0x29   :  { %670 = vmatpush3.msra.mxu1 %v78_v3  ;;  %689 = vmatprep.subr.mxu0 %v802_v2  ;;  %p777_p3 = scmp.lt.s32.totalorder %s644_s10, %s644_s10 }
  0x2a   :  { %674 = vmatprep.subr.mxu1 %v802_v2  ;;  %v156_v7 = vand.u32 4294901760, %v155_v4 }
  0x2c   :  { %v157_v10 = vsub.f32 %v155_v4, %v156_v7 }
  0x2e   :  { %v158_v13 = vand.u32 4294901760, %v157_v10 }
  0xa6   :  { %v57_v5 = vpop.trf.xlu0 }
  0xa7   :  { %v75_v6 = vsel %vm73_vm1, %v57_v5, 0 }
  0xa8   :  { %v143_v8 = vand.u32 4294901760, %v75_v6 }
  0xaa   :  { %v144_v9 = vsub.f32 %v75_v6, %v143_v8 }
  0xac   :  { %v145_v11 = vand.u32 4294901760, %v144_v9 }
  0xae   :  { %687 = vmatmul.mubr.f32.vlgmr.msra.gmra.mrb[0].mxu0 %v145_v11  ;;  %v146_v12 = vsub.f32 %v144_v9, %v145_v11 }
  0xaf   :  { %690 = vmatpush3.msra.mxu0 %v156_v7  ;;  %691 = vmatprep.mubr.msk.f32.mxu0 %vm803_vm0, %v802_v2 }
  0xb0   :  { %v147_v14 = vand.u32 4294901760, %v146_v12  ;;  %694 = vmatprep.subr.mxu0 %v802_v2 }
  0xb2   :  { %672 = vmatmul.mubr.f32.vlgmr.msra.gmra.mrb[0].mxu1 %v147_v14 }
  0xb3   :  { %675 = vmatpush3.msra.mxu1 %v158_v13  ;;  %676 = vmatprep.mubr.msk.f32.mxu1 %vm803_vm0, %v802_v2 }
  0xb4   :  { %679 = vmatprep.subr.mxu1 %v802_v2 }
  0xb6   :  { %692 = vmatmul.mubr.f32.vlgmr.msra.gmra.mrb[0].mxu0 %v143_v8 }
  0xb7   :  { %695 = vmatpush3.msra.mxu0 %v78_v3  ;;  %696 = vmatprep.mubr.msk.f32.mxu0 %vm803_vm0, %v802_v2 }
  0xba   :  { %677 = vmatmul.mubr.f32.vlgmr.msra.gmra.mrb[0].mxu1 %v143_v8 }
  0xbb   :  { %680 = vmatpush3.msra.mxu1 %v155_v4  ;;  %681 = vmatprep.mubr.msk.f32.mxu1 %vm803_vm0, %v802_v2 }
  0xbe   :  { %697 = vmatmul.mubr.f32.vlgmr.msra.gmra.mrb[0].mxu0 %v143_v8 }
  0xc2   :  { %682 = vmatmul.mubr.f32.vlgmr.msra.gmra.mrb[0].mxu1 %v144_v9 }
 0x191   :  { %v519_v15 = vpop.f32.mrb[0].mxu0 }
 0x192   :  { %v698_v16 = vpop.f32.mrb[1].mxu0 }
 0x195   :  { %v299_v17 = vpop.f32.mrb[0].mxu1 }
 0x196   :  { %v862_v18 = vadd.f32 %v519_v15, %v299_v17  ;;  %v683_v19 = vpop.f32.mrb[1].mxu1 }
 0x198   :  { %v528_v20 = vand.u32 2139095040, %v862_v18  ;;  %v525_v21 = vand.u32 2147483647, %v862_v18  ;;  %vm527_vm9 = vcmp.lt.s32.totalorder %v862_v18, 0  ;;  %vm617_vm0 = vweird.f32 %v862_v18 }
 0x19a   :  { %v529_v22 = vshrl.u32 %v528_v20, 23  ;;  %v532_v24 = vand.u32 8388607, %v525_v21  ;;  %vm526_vm10 = vcmp.le.f32.partialorder %v525_v21, 0.7853982 }
 0x19c   :  { %v653_v23 = vadd.s32 4294967169, %v529_v22  ;;  %v533_v27 = vor.u32 8388608, %v532_v24 }
 0x19e   :  { %v535_v25 = vadd.s32 1, %v653_v23  ;;  %v573_v35 = vshll.u32 %v533_v27, 8 }
 0x1a0   :  { %vm536_vm2 = vcmp.gt.s32.totalorder %v535_v25, 0 }
 0x1a1   :  { %v537_v26 = vsel %vm536_vm2, %v535_v25, 0 }
 0x1a2   :  { %v539_v28 = vand.u32 31, %v537_v26  ;;  %v538_v29 = vshrl.u32 %v537_v26, 5 }
 0x1a4   :  { %v540_v30 = vsub.s32 32, %v539_v28  ;;  %v551_v32 = vshll.u32 %v804_v31, %v539_v28  ;;  %v554_v34 = vshll.u32 %v805_v33, %v539_v28  ;;  %v542_v40 = vshll.u32 %v807_v39, %v539_v28 }
 0x1a5   :  { %v545_v43 = vshll.u32 %v808_v41, %v539_v28  ;;  %v548_v46 = vshll.u32 %v809_v44, %v539_v28  ;;  %vm560_vm3 = vcmp.lt.s32.totalorder %v538_v29, 4  ;;  %vm557_vm4 = vcmp.lt.s32.totalorder %v538_v29, 1 }
 0x1a6   :  { %v552_v36 = vshrl.u32 %v805_v33, %v540_v30  ;;  %v555_v38 = vshrl.u32 %v806_v37, %v540_v30  ;;  %v543_v42 = vshrl.u32 %v808_v41, %v540_v30  ;;  %v546_v45 = vshrl.u32 %v809_v44, %v540_v30 }
 0x1a7   :  { %v549_v47 = vshrl.u32 %v804_v31, %v540_v30  ;;  %v541_v51 = vshrl.u32 %v807_v39, %v540_v30  ;;  %vm558_vm5 = vcmp.lt.s32.totalorder %v538_v29, 2  ;;  %vm559_vm6 = vcmp.lt.s32.totalorder %v538_v29, 3  ;;  %v523_v39 = vld [vmem:[%s901_s2] sm:$0x1]  ;;  %s772_s2 = scalar_lea.vmem %s644_s10, 128 }
 0x1a8   :  { %v553_v48 = vor.u32 %v552_v36, %v551_v32  ;;  %v556_v49 = vor.u32 %v555_v38, %v554_v34  ;;  %v544_v50 = vor.u32 %v543_v42, %v542_v40  ;;  %v547_v52 = vor.u32 %v546_v45, %v545_v43  ;;  %p773_p2 = scmp.ne.s32.totalorder %s644_s10, %s772_s2  ;;  %p778_p4 = scmp.lt.s32.totalorder %s772_s2, %s772_s2 }
 0x1a9   :  { %v550_v53 = vor.u32 %v549_v47, %v548_v46  ;;  %v630_v37 = vlaneseq  ;;  %vm524_vm11 = vcmp.ne.f32.partialorder %v523_v39, 0.0  ;;  %v810_v44 = vmov 0  }
 0x1aa   :  { %v566_v54 = vsel %vm560_vm3, %v553_v48, 920167782  ;;  %v570_v55 = vsel %vm560_vm3, %v556_v49, 1326507024  ;;  %v565_v57 = vsel %vm557_vm4, %v544_v50, %v547_v52  ;;  %v561_v60 = vsel %vm557_vm4, %v541_v51, %v544_v50  ;;  %p779_p5 = por %p778_p4, %p777_p3 }
 0x1ab   :  { %v562_v56 = vsel %vm560_vm3, %v550_v53, 2102212464  ;;  %v567_v58 = vsel %vm559_vm6, %v550_v53, %v566_v54  ;;  %v569_v59 = vsel %vm557_vm4, %v547_v52, %v550_v53  ;;  %v571_v63 = vsel %vm559_vm6, %v553_v48, %v570_v55 }
 0x1ac   :  { %v563_v61 = vsel %vm559_vm6, %v547_v52, %v562_v56  ;;  %v568_v62 = vsel %vm558_vm5, %v565_v57, %v567_v58  ;;  %v572_v0 = vsel %vm558_vm5, %v569_v59, %v571_v63  ;;  %v631_v41 = vshrl.u32 %v630_v37, 7  ;;  %p780_p6 = pnand %p779_p5, %p773_p2 }
 0x1ad   :  { %v868_v1 = vmul.u32.u64.low %v573_v35, %v568_v62  ;;  %v869_v2 = vmul.u32.u64.high %v573_v35, %v568_v62, %v868_v1  ;;  %v871_v3 = vmul.u32.u64.low %v573_v35, %v572_v0  ;;  %v872_v4 = vmul.u32.u64.high %v573_v35, %v572_v0, %v871_v3 }
 0x1ae   :  { %v564_v5 = vsel %vm558_vm5, %v561_v60, %v563_v61  ;;  %v632_v43 = vsub.s32 0, %v631_v41  ;;  %v629_v45 = vsel %vm524_vm11, 1, %v810_v44 }
 0x1af   :  { %v583_v6 = vadd.s32 1, %v869_v2  ;;  %v580_v7 = vmul.u32 %v573_v35, %v564_v5  ;;  %vm582_vm7 = vc.u32 %v872_v4, %v868_v1  ;;  %v581_v20 = vadd.s32 %v868_v1, %v872_v4 }
 0x1b0   :  { %v633_v47 = vrot.slane %v629_v45, %v632_v43 }
 0x1b1   :  { %v584_v8 = vsel %vm582_vm7, %v583_v6, %v869_v2 }
 0x1b2   :  { %v585_v9 = vadd.s32 %v584_v8, %v580_v7  ;;  %vm634_vm15 = vcmp.eq.s32.totalorder %v633_v47, 1 }
 0x1b4   :  { %v586_v10 = vadd.s32 536870912, %v585_v9 }
 0x1b6   :  { %v587_v11 = vshrl.u32 %v586_v10, 30 }
 0x1b8   :  { %v588_v12 = vshll.u32 %v587_v11, 30  ;;  %v611_v33 = vsub.s32 4, %v587_v11 }
 0x1ba   :  { %v589_v13 = vsub.s32 %v585_v9, %v588_v12  ;;  %v612_v36 = vsel %vm527_vm9, %v611_v33, %v587_v11 }
 0x1bb   :  { %v614_v40 = vsel %vm526_vm10, 0, %v612_v36 }
 0x1bc   :  { %v591_v14 = vsub.s32 0, %v589_v13  ;;  %v618_v42 = vadd.s32 3, %v614_v40 }
 0x1be   :  { %v654_v15 = vmin.u32 %v591_v14, %v589_v13  ;;  %v619_v46 = vand.u32 3, %v618_v42 }
 0x1c0   :  { %v593_v16 = vclz %v654_v15  ;;  %vm624_vm12 = vcmp.eq.s32.totalorder %v619_v46, 2  ;;  %vm621_vm13 = vcmp.eq.s32.totalorder %v619_v46, 0  ;;  %vm620_vm14 = vcmp.lt.s32.totalorder %v619_v46, 2 }
 0x1c2   :  { %v655_v17 = vadd.s32 4294967294, %v593_v16 }
 0x1c4   :  { %vm656_vm8 = vcmp.lt.s32.totalorder %v655_v17, 0 }
 0x1c5   :  { %v596_v19 = vsel %vm656_vm8, 0, %v655_v17 }
 0x1c6   :  { %v597_v22 = vsub.s32 32, %v596_v19  ;;  %v601_v23 = vsub.s32 4294967266, %v596_v19  ;;  %v598_v24 = vshll.u32 %v589_v13, %v596_v19 }
 0x1c8   :  { %v599_v25 = vshrl.u32 %v581_v20, %v597_v22  ;;  %v602_v26 = vadd.s32 127, %v601_v23 }
 0x1ca   :  { %v600_v27 = vor.u32 %v599_v25, %v598_v24  ;;  %v603_v28 = vshll.u32 %v602_v26, 23 }
 0x1cc   :  { %v604_v29 = vor.u32 4788187, %v603_v28  ;;  %v607_v31 = vcvt.s32.f32 %v600_v27 }
 0x1ce   :  { %v605_v30 = vand.u32 2147483647, %v604_v29 }
 0x1d0   :  { %v608_v32 = vmul.f32 %v607_v31, %v605_v30 }
 0x1d2   :  { %v609_v34 = vxor.u32 2147483648, %v608_v32 }
 0x1d4   :  { %v610_v35 = vsel %vm527_vm9, %v609_v34, %v608_v32 }
 0x1d5   :  { %v613_v38 = vsel %vm526_vm10, %v862_v18, %v610_v35 }
 0x1d6   :  { %724 = vcosq.f32 %v613_v38 }
 0x1d7   :  { %726 = vsinq.f32 %v613_v38 }
 0x1e0   :  { %v725_v21 = vpop.eup %724 }
 0x1e1   :  { %v727_v48 = vpop.eup %726  ;;  %v625_v49 = vxor.u32 2147483648, %v725_v21 }
 0x1e2   :  { %v622_v50 = vxor.u32 2147483648, %v727_v48 }
 0x1e3   :  { %v626_v51 = vsel %vm624_vm12, %v625_v49, %v727_v48 }
 0x1e4   :  { %v623_v52 = vsel %vm621_vm13, %v725_v21, %v622_v50 }
 0x1e5   :  { %v627_v53 = vsel %vm620_vm14, %v623_v52, %v626_v51 }
 0x1e6   :  { %v628_v54 = vsel %vm617_vm0, nan, %v627_v53 }
 0x1e7   :  { %v635_v55 = vsel %vm634_vm15, %v628_v54, %v862_v18 }
 0x1e8   :  { %636 = vst [vmem:[#allocation7] sm:$0xff] %v635_v55 }
 0x1e9   :  { %783 = shalt.err (!%p780_p6)
}
 0x1ea   :  { %s784_s13 = scalar_lea.hbm %s902_s3, 128 }
 0x1eb   :  { %p785_p7 = scmp.ne.s32.totalorder %s902_s3, %s784_s13  ;;  %p788_p8 = scmp.lt.u32.totalorder %s784_s13, %s902_s3 }
 0x1ed   :  { %p790_p9 = pnand %p788_p8, %p785_p7 }
 0x1ef   :  { %793 = shalt.err (!%p790_p9)
}
 0x1f0   :  { %646 = dma.vmem_to_hbm [thread:$0]  %s644_s10, 128, %s902_s3, [#allocation4]  }
 0x1f1   :  { %798 = dma.done.wait [#allocation4], 128  }
 0x1f2   :  { %799 = vsyncadd [#allocation4], 4294967168 }
 0x1f3   :  { %650 = vsyncpa [#allocation3], 1 }
 0x1f4   :  { %651 = vsyncpa [#allocation6], 1 }
 0x1f5   :  { %652 = vsyncpa [#allocation4], 1 }

</bundles_post_ra>
